<compile_context>
chip_gen: v7x
topology: tpu7x:2x2x1
jax: 0.10.0
libtpu: 0.0.40
codegen_flags: <defaults>
</compile_context>

<pallas_src>
import functools
import math

import jax
import jax.numpy as jnp
import numpy as np
from jax import lax
from jax.experimental import pallas as pl
from jax.experimental.pallas import tpu as pltpu


def _round_up(x: int, m: int) -> int:
    return (x + m - 1) // m * m


def _stable_softplus(x):
    # softplus(x) = max(x, 0) + log(1 + exp(-|x|)) : no overflow for large rho,
    # only 2 EUP transcendentals per element (exp + log).
    # TODO(synk): on v6e/v7x this exp/log could run in bf16 on the EUP (~2x rate) if it
    # ever co-binds with HBM after the traffic cuts; v5e's EUP has no bf16, keep f32.
    return jnp.maximum(x, 0.0) + jnp.log(1.0 + jnp.exp(-jnp.abs(x)))


def _scalar_pair_tile(a_11, b_11):
    """Dense (8,128) f32 tile with a at [0,0], b at [0,1], zeros elsewhere."""
    row = lax.broadcasted_iota(jnp.int32, (8, 128), 0)
    lane = lax.broadcasted_iota(jnp.int32, (8, 128), 1)
    first = row == 0
    return (jnp.where(first & (lane == 0), a_11, 0.0)
            + jnp.where(first & (lane == 1), b_11, 0.0))


def _bbb_kernel(x_ref, wmu_ref, wrho_ref, weps_ref, bmu_ref, brho_ref, beps_ref,
                y_ref, w_ref, b_ref, part_ref,
                sq_acc, post_acc,
                *, block_n, block_k, n_valid, k_valid, mask_n, mask_k,
                matmul_dtype, x_resident):
    i = pl.program_id(0)            # out-feature tile  ("parallel": shards across TCs)
    k = pl.program_id(1)            # in-feature tile   ("arbitrary": reduction, innermost)
    last_k = pl.num_programs(1) - 1

    wmu = wmu_ref[...]
    wrho = wrho_ref[...]
    weps = weps_ref[...]

    # Reparameterized weight sample: w = mu + softplus(rho) * eps.
    w_sigma = _stable_softplus(wrho)
    w = wmu + w_sigma * weps
    # Narrow writeback (default bf16) cuts HBM traffic; matmul/log-probs use f32 w.
    w_ref[...] = w.astype(w_ref.dtype)

    # Per-tile log-prob pieces (constants hoisted to the wrapper):
    #   prior     needs  sum(w^2)                         (padded w is exactly 0)
    #   posterior needs  sum(log sigma + 0.5*eps^2)  since (w - mu) == sigma*eps
    log_wsigma = jnp.log(w_sigma)
    if mask_n or mask_k:                      # static: compiled away when unpadded
        valid = None
        if mask_n:
            rows = lax.broadcasted_iota(jnp.int32, w.shape, 0) + i * block_n
            valid = rows < n_valid
        if mask_k:
            cols = lax.broadcasted_iota(jnp.int32, w.shape, 1) + k * block_k
            cvalid = cols < k_valid
            valid = cvalid if valid is None else valid & cvalid
        log_wsigma = jnp.where(valid, log_wsigma, 0.0)

    sq_w = jnp.sum(w * w, keepdims=True)                                   # (1,1)
    post_w = jnp.sum(log_wsigma + 0.5 * (weps * weps), keepdims=True)      # (1,1), fused

    # MXU: y_tile += x[:, k-slice] @ w_tile.T, contracting the last dims of both
    # operands (native transposed-RHS MXU path; no XLU transpose of the big w tile).
    if x_resident:
        k_off = pl.multiple_of(k * block_k, block_k)
        x_blk = x_ref[:, pl.ds(k_off, block_k)]
    else:
        x_blk = x_ref[...]
    partial = lax.dot_general(
        x_blk.astype(matmul_dtype), w.astype(matmul_dtype),
        dimension_numbers=(((1,), (1,)), ((), ())),
        preferred_element_type=jnp.float32)

    @pl.when(k == 0)
    def _first_k_tile():
        # Bias sampling + bias log-prob terms, once per out-feature tile.
        bmu = bmu_ref[...]
        brho = brho_ref[...]
        beps = beps_ref[...]
        b_sigma = _stable_softplus(brho)
        b = bmu + b_sigma * beps
        b_ref[...] = b

        log_bsigma = jnp.log(b_sigma)
        if mask_n:
            lanes = lax.broadcasted_iota(jnp.int32, b.shape, 1) + i * block_n
            log_bsigma = jnp.where(lanes < n_valid, log_bsigma, 0.0)

        sq_acc[...] = sq_w + jnp.sum(b * b, keepdims=True)
        post_acc[...] = post_w + jnp.sum(log_bsigma + 0.5 * (beps * beps), keepdims=True)
        y_ref[...] = partial + b                      # bias broadcast over batch

    @pl.when(k != 0)
    def _rest_k_tiles():
        sq_acc[...] += sq_w
        post_acc[...] += post_w
        y_ref[...] += partial

    @pl.when(k == last_k)
    def _finalize_tile():
        # Lane-dense (8,128) partial-sum tile, built and stored once per i-tile.
        part_ref[...] = _scalar_pair_tile(sq_acc[...], post_acc[...])


def _vmem_budget_bytes() -> int:
    phys = 64 * 1024 * 1024          # safe fallback = v7x physical VMEM
    try:
        phys = int(pltpu.get_tpu_info().vmem_capacity_bytes)
    except Exception:
        pass
    return max(32 * 1024 * 1024, (phys * 3) // 4)


def _vmem_estimate(bp, bn, bk, k_pad, x_resident, w_itemsize):
    est = 3 * bn * bk * 4 * 2                                   # mu/rho/eps streams (dbl-buf)
    est += bn * bk * w_itemsize * 2                             # sampled-w writeback stream
    est += (bp * k_pad * 4 * 2) if x_resident else (bp * bk * 4 * 2)   # x
    est += bp * bn * 4 * 2                                      # y accumulator block
    est += 6 * bn * 4 * 2                                       # bias mu/rho/eps + sampled b
    est += 2 * 8 * 128 * 4 * 2 + 2 * 8 * 128 * 4                # parts tile + scalar scratch
    return est


def linear_bbb_forward(x, w_mu, w_rho, w_eps, b_mu, b_rho, b_eps,
                       prior_var=6.0, *, block_n=512, block_k=1024,
                       matmul_dtype=jnp.bfloat16, w_dtype=jnp.bfloat16):
    """Bayes-by-Backprop linear forward.

    Returns (y, w, b, log_prior, log_post): y is the module's return value,
    (w, b, log_prior, log_post) mirror the attributes forward() stores on self.
    y / log-probs are computed from the f32 sampled w regardless of `w_dtype`
    (which only controls the dtype of the returned w).  Pass
    matmul_dtype=jnp.float32, w_dtype=jnp.float32 for a bit-tight reference path.
    Note: prior_var is used as the Normal *scale* (std), matching the PyTorch
    module's Normal(0, prior_var).
    """
    f32 = jnp.float32
    x = jnp.asarray(x, f32)
    w_mu = jnp.asarray(w_mu, f32)
    w_rho = jnp.asarray(w_rho, f32)
    w_eps = jnp.asarray(w_eps, f32)
    b_mu = jnp.asarray(b_mu, f32)
    b_rho = jnp.asarray(b_rho, f32)
    b_eps = jnp.asarray(b_eps, f32)

    batch, in_features = x.shape
    out_features = w_mu.shape[0]

    # ---- tile selection (128-aligned, VMEM-budgeted, megacore-balanced) ------
    bp = _round_up(batch, 8)
    n128 = _round_up(out_features, 128)
    k128 = _round_up(in_features, 128)
    bn = min(_round_up(block_n, 128), n128)
    bk = min(_round_up(block_k, 128), k128)

    # v7x has 2 TensorCores: make the "parallel" out-feature axis >= 2 tiles
    # whenever the layer is big enough (harmless on 1-TC v5e/v6e).
    if n128 >= 256 and n128 <= bn:
        bn = _round_up((n128 + 1) // 2, 128)

    budget = _vmem_budget_bytes()
    w_itemsize = jnp.dtype(w_dtype).itemsize

    def est(bn_, bk_, xres):
        return _vmem_estimate(bp, bn_, bk_, _round_up(in_features, bk_), xres, w_itemsize)

    # Keep x resident only while it is a small fraction of the VMEM budget
    # (large batch x in_features must not blow v7x's 64 MiB).
    x_resident = bp * k128 * 4 <= budget // 4
    while est(bn, bk, x_resident) > budget and bk > 128:
        bk = _round_up(max(128, bk // 2), 128)
    while est(bn, bk, x_resident) > budget and bn > 128:
        bn = _round_up(max(128, bn // 2), 128)
    if x_resident and est(bn, bk, x_resident) > budget:
        x_resident = False

    n_pad = _round_up(out_features, bn)
    k_pad = _round_up(in_features, bk)
    grid_n = n_pad // bn
    grid_k = k_pad // bk
    mask_n = n_pad != out_features
    mask_k = k_pad != in_features

    def pad2(a, rows, cols):
        pr, pc = rows - a.shape[0], cols - a.shape[1]
        if pr == 0 and pc == 0:
            return a
        return jnp.pad(a, ((0, pr), (0, pc)))      # zero padding

    x_p = pad2(x, bp, k_pad)
    wmu_p = pad2(w_mu, n_pad, k_pad)
    wrho_p = pad2(w_rho, n_pad, k_pad)   # padded rho harmless: mu/eps pads are 0,
    weps_p = pad2(w_eps, n_pad, k_pad)   # and log(sigma) is masked in-kernel
    bmu_p = pad2(b_mu.reshape(1, -1), 1, n_pad)
    brho_p = pad2(b_rho.reshape(1, -1), 1, n_pad)
    beps_p = pad2(b_eps.reshape(1, -1), 1, n_pad)

    kernel = functools.partial(
        _bbb_kernel, block_n=bn, block_k=bk,
        n_valid=out_features, k_valid=in_features,
        mask_n=mask_n, mask_k=mask_k,
        matmul_dtype=matmul_dtype, x_resident=x_resident)

    if x_resident:
        x_spec = pl.BlockSpec((bp, k_pad), lambda i, k: (0, 0))   # x resident in VMEM
    else:
        x_spec = pl.BlockSpec((bp, bk), lambda i, k: (0, k))      # x streamed over k

    grid_spec = pltpu.PrefetchScalarGridSpec(
        num_scalar_prefetch=0,
        grid=(grid_n, grid_k),
        in_specs=[
            x_spec,
            pl.BlockSpec((bn, bk), lambda i, k: (i, k)),      # w_mu
            pl.BlockSpec((bn, bk), lambda i, k: (i, k)),      # w_rho
            pl.BlockSpec((bn, bk), lambda i, k: (i, k)),      # w_eps
            pl.BlockSpec((1, bn), lambda i, k: (0, i)),       # b_mu
            pl.BlockSpec((1, bn), lambda i, k: (0, i)),       # b_rho
            pl.BlockSpec((1, bn), lambda i, k: (0, i)),       # b_eps
        ],
        out_specs=(
            pl.BlockSpec((bp, bn), lambda i, k: (0, i)),      # y (resident over k)
            pl.BlockSpec((bn, bk), lambda i, k: (i, k)),      # sampled w (narrow dtype)
            pl.BlockSpec((1, bn), lambda i, k: (0, i)),       # sampled b
            pl.BlockSpec((8, 128), lambda i, k: (i, 0)),      # per-i-tile partial sums
        ),
        scratch_shapes=[
            pltpu.VMEM((1, 1), f32),    # running sum(w^2)+sum(b^2)
            pltpu.VMEM((1, 1), f32),    # running sum(log sigma + 0.5*eps^2)
        ],
    )

    y_p, w_p, b_p, parts = pl.pallas_call(
        kernel,
        grid_spec=grid_spec,
        out_shape=(
            jax.ShapeDtypeStruct((bp, n_pad), f32),
            jax.ShapeDtypeStruct((n_pad, k_pad), w_dtype),
            jax.ShapeDtypeStruct((1, n_pad), f32),
            jax.ShapeDtypeStruct((grid_n * 8, 128), f32),
        ),
        compiler_params=pltpu.CompilerParams(
            dimension_semantics=("parallel", "arbitrary"),
            vmem_limit_bytes=budget,
        ),
    )(x_p, wmu_p, wrho_p, weps_p, bmu_p, brho_p, beps_p)

    # ---- hoisted constants + tiny wrapper-side reductions --------------------
    n_terms = out_features * in_features + out_features
    half_log_2pi = 0.5 * math.log(2.0 * math.pi)
    prior_scale = float(prior_var)       # used as Normal *scale*, same as the module

    sq_sum = jnp.sum(parts[0::8, 0])     # sum(w^2) + sum(b^2)
    post_sum = jnp.sum(parts[0::8, 1])   # sum(log sigma) + 0.5*sum(eps^2)

    log_prior = (-n_terms * (math.log(prior_scale) + half_log_2pi)
                 - sq_sum / (2.0 * prior_scale * prior_scale))
    log_post = -n_terms * half_log_2pi - post_sum

    y = y_p[:batch, :out_features]
    w = w_p[:out_features, :in_features]
    b = b_p[0, :out_features]
    return y, w, b, log_prior, log_post


# ------------------------------ verification ---------------------------------

def _reference(x, w_mu, w_rho, w_eps, b_mu, b_rho, b_eps, prior_var=6.0):
    w_sigma = jnp.log1p(jnp.exp(w_rho))
    b_sigma = jnp.log1p(jnp.exp(b_rho))
    w = w_mu + w_sigma * w_eps
    b = b_mu + b_sigma * b_eps

    def norm_logprob(v, loc, scale):
        return (-jnp.log(scale) - 0.5 * jnp.log(2.0 * jnp.pi)
                - (v - loc) ** 2 / (2.0 * scale ** 2))

    log_prior = (jnp.sum(norm_logprob(w, 0.0, prior_var))
                 + jnp.sum(norm_logprob(b, 0.0, prior_var)))
    log_post = (jnp.sum(norm_logprob(w, w_mu, w_sigma))
                + jnp.sum(norm_logprob(b, b_mu, b_sigma)))
    y = x @ w.T + b
    return y, w, b, log_prior, log_post


def _run_case(key, batch, in_features, out_features, prior_var,
              matmul_dtype, w_dtype, y_rtol, y_atol, w_tol, lp_tol):
    k_x, k_wmu, k_bmu, k_weps, k_beps = jax.random.split(key, 5)
    x = jax.random.normal(k_x, (batch, in_features), dtype=jnp.float32)
    # Parameter init mirroring __init__ (w_rho/b_rho "uniform(-6,-6)" == -6),
    # eps drawn explicitly so the forward is deterministic and checkable.
    w_mu = jax.random.uniform(k_wmu, (out_features, in_features),
                              minval=-0.6, maxval=0.6, dtype=jnp.float32)
    w_rho = jnp.full((out_features, in_features), -6.0, jnp.float32)
    b_mu = jax.random.uniform(k_bmu, (out_features,),
                              minval=-0.6, maxval=0.6, dtype=jnp.float32)
    b_rho = jnp.full((out_features,), -6.0, jnp.float32)
    w_eps = jax.random.normal(k_weps, (out_features, in_features), jnp.float32)
    b_eps = jax.random.normal(k_beps, (out_features,), jnp.float32)

    y, w, b, log_prior, log_post = linear_bbb_forward(
        x, w_mu, w_rho, w_eps, b_mu, b_rho, b_eps, prior_var=prior_var,
        matmul_dtype=matmul_dtype, w_dtype=w_dtype)
    jax.block_until_ready((y, w, b, log_prior, log_post))

    y_r, w_r, b_r, lp_r, lq_r = _reference(
        x, w_mu, w_rho, w_eps, b_mu, b_rho, b_eps, prior_var=prior_var)
    np.testing.assert_allclose(np.asarray(y), np.asarray(y_r),
                               rtol=y_rtol, atol=y_atol)
    np.testing.assert_allclose(np.asarray(jnp.asarray(w, jnp.float32)),
                               np.asarray(w_r), rtol=w_tol, atol=w_tol)
    np.testing.assert_allclose(np.asarray(b), np.asarray(b_r), rtol=1e-6, atol=1e-6)
    np.testing.assert_allclose(float(log_prior), float(lp_r), rtol=lp_tol, atol=lp_tol)
    np.testing.assert_allclose(float(log_post), float(lq_r), rtol=lp_tol, atol=lp_tol)


if __name__ == "__main__":
    key = jax.random.PRNGKey(0)
    k1, k2 = jax.random.split(key)
    # Tutorial-scale shape, exact f32 path (single padded tile; row+col masking).
    _run_case(k1, batch=8, in_features=32, out_features=16, prior_var=6.0,
              matmul_dtype=jnp.float32, w_dtype=jnp.float32,
              y_rtol=1e-5, y_atol=1e-5, w_tol=1e-6, lp_tol=1e-4)
    # Larger shape on the default fast path (bf16 MXU + bf16 sampled-w writeback):
    # exercises the 2-TC out-feature split, k-accumulation and padded-tile masking.
    _run_case(k2, batch=16, in_features=640, out_features=384, prior_var=6.0,
              matmul_dtype=jnp.bfloat16, w_dtype=jnp.bfloat16,
              y_rtol=2e-2, y_atol=2e-1, w_tol=1e-2, lp_tol=2e-4)
    print("KERNEL_OK")
</pallas_src>

<mosaic_0001>
module attributes {stable_mosaic.version = 11 : i64} {
  func.func @_bbb_kernel(%arg0: i32, %arg1: i32, %arg2: memref<8x128xf32, #tpu.memory_space<vmem>>, %arg3: memref<128x128xf32, #tpu.memory_space<vmem>>, %arg4: memref<128x128xf32, #tpu.memory_space<vmem>>, %arg5: memref<128x128xf32, #tpu.memory_space<vmem>>, %arg6: memref<1x128xf32, #tpu.memory_space<vmem>>, %arg7: memref<1x128xf32, #tpu.memory_space<vmem>>, %arg8: memref<1x128xf32, #tpu.memory_space<vmem>>, %arg9: memref<8x128xf32, #tpu.memory_space<vmem>>, %arg10: memref<128x128xf32, #tpu.memory_space<vmem>>, %arg11: memref<1x128xf32, #tpu.memory_space<vmem>>, %arg12: memref<8x128xf32, #tpu.memory_space<vmem>>, %arg13: memref<1x1xf32, #tpu.memory_space<vmem>>, %arg14: memref<1x1xf32, #tpu.memory_space<vmem>>) attributes {dimension_semantics = [#tpu.dimension_semantics<parallel>, #tpu.dimension_semantics<arbitrary>], iteration_bounds = array<i64: 1, 1>, scalar_prefetch = 0 : i64, scratch_operands = 2 : i64, tpu.core_type = #tpu.core_type<tc>, window_params = [{pipeline_mode = #tpu.pipeline_mode<synchronous>, transform_indices = @transform_0, window_bounds = array<i64: 8, 128>}, {transform_indices = @transform_1, window_bounds = array<i64: 128, 128>}, {transform_indices = @transform_2, window_bounds = array<i64: 128, 128>}, {transform_indices = @transform_3, window_bounds = array<i64: 128, 128>}, {transform_indices = @transform_4, window_bounds = array<i64: 1, 128>}, {transform_indices = @transform_5, window_bounds = array<i64: 1, 128>}, {transform_indices = @transform_6, window_bounds = array<i64: 1, 128>}, {transform_indices = @transform_7, window_bounds = array<i64: 8, 128>}, {transform_indices = @transform_8, window_bounds = array<i64: 128, 128>}, {transform_indices = @transform_9, window_bounds = array<i64: 1, 128>}, {transform_indices = @transform_10, window_bounds = array<i64: 8, 128>}]} {
    %c0 = arith.constant 0 : index
    %c0_0 = arith.constant 0 : index
    %0 = vector.load %arg3[%c0, %c0_0] : memref<128x128xf32, #tpu.memory_space<vmem>>, vector<128x128xf32>
    %c0_1 = arith.constant 0 : index
    %c0_2 = arith.constant 0 : index
    %1 = vector.load %arg4[%c0_1, %c0_2] : memref<128x128xf32, #tpu.memory_space<vmem>>, vector<128x128xf32>
    %c0_3 = arith.constant 0 : index
    %c0_4 = arith.constant 0 : index
    %2 = vector.load %arg5[%c0_3, %c0_4] : memref<128x128xf32, #tpu.memory_space<vmem>>, vector<128x128xf32>
    %cst = arith.constant 0.000000e+00 : f32
    %3 = vector.broadcast %cst : f32 to vector<128x128xf32>
    %4 = arith.maximumf %1, %3 : vector<128x128xf32>
    %5 = math.absf %1 : vector<128x128xf32>
    %cst_5 = arith.constant 0.000000e+00 : f32
    %6 = vector.broadcast %cst_5 : f32 to vector<128x128xf32>
    %7 = arith.subf %6, %5 : vector<128x128xf32>
    %8 = math.exp %7 : vector<128x128xf32>
    %cst_6 = arith.constant 1.000000e+00 : f32
    %9 = vector.broadcast %cst_6 : f32 to vector<128x128xf32>
    %10 = arith.addf %9, %8 : vector<128x128xf32>
    %11 = math.log %10 : vector<128x128xf32>
    %12 = arith.addf %4, %11 : vector<128x128xf32>
    %13 = arith.mulf %12, %2 : vector<128x128xf32>
    %14 = arith.addf %0, %13 : vector<128x128xf32>
    %c0_7 = arith.constant 0 : index
    %c0_8 = arith.constant 0 : index
    %15 = vector.load %arg10[%c0_7, %c0_8] : memref<128x128xf32, #tpu.memory_space<vmem>>, vector<128x128xf32>
    tpu.vector_store %arg10[%c0_7, %c0_8], %14 {strides = array<i32>} : memref<128x128xf32, #tpu.memory_space<vmem>>, vector<128x128xf32>,
    %16 = math.log %12 : vector<128x128xf32>
    %17 = tpu.iota {dimensions = array<i32: 0>} : vector<128x128xi32>
    %c128_i32 = arith.constant 128 : i32
    %18 = arith.muli %arg0, %c128_i32 : i32
    %19 = vector.broadcast %18 : i32 to vector<128x128xi32>
    %20 = arith.addi %17, %19 : vector<128x128xi32>
    %c16_i32 = arith.constant 16 : i32
    %21 = vector.broadcast %c16_i32 : i32 to vector<128x128xi32>
    %22 = arith.cmpi slt, %20, %21 : vector<128x128xi32>
    %23 = tpu.iota {dimensions = array<i32: 1>} : vector<128x128xi32>
    %c128_i32_9 = arith.constant 128 : i32
    %24 = arith.muli %arg1, %c128_i32_9 : i32
    %25 = vector.broadcast %24 : i32 to vector<128x128xi32>
    %26 = arith.addi %23, %25 : vector<128x128xi32>
    %c32_i32 = arith.constant 32 : i32
    %27 = vector.broadcast %c32_i32 : i32 to vector<128x128xi32>
    %28 = arith.cmpi slt, %26, %27 : vector<128x128xi32>
    %29 = arith.andi %22, %28 : vector<128x128xi1>
    %cst_10 = arith.constant 0.000000e+00 : f32
    %30 = vector.broadcast %cst_10 : f32 to vector<128x128xf32>
    %31 = arith.select %29, %16, %30 : vector<128x128xi1>, vector<128x128xf32>
    %32 = arith.mulf %14, %14 : vector<128x128xf32>
    %33 = vector.shape_cast %32 : vector<128x128xf32> to vector<1x128x128xf32>
    %cst_11 = arith.constant dense<0.000000e+00> : vector<1xf32>
    %34 = vector.multi_reduction <add>, %33, %cst_11 [1, 2] : vector<1x128x128xf32> to vector<1xf32>
    %35 = vector.shape_cast %34 : vector<1xf32> to vector<1x1x1xf32>
    %36 = vector.extract %35[0, 0, 0] : f32 from vector<1x1x1xf32>
    %37 = vector.broadcast %36 : f32 to vector<1x1xf32>
    %38 = arith.mulf %2, %2 : vector<128x128xf32>
    %cst_12 = arith.constant 5.000000e-01 : f32
    %39 = vector.broadcast %cst_12 : f32 to vector<128x128xf32>
    %40 = arith.mulf %39, %38 : vector<128x128xf32>
    %41 = arith.addf %31, %40 : vector<128x128xf32>
    %42 = vector.shape_cast %41 : vector<128x128xf32> to vector<1x128x128xf32>
    %cst_13 = arith.constant dense<0.000000e+00> : vector<1xf32>
    %43 = vector.multi_reduction <add>, %42, %cst_13 [1, 2] : vector<1x128x128xf32> to vector<1xf32>
    %44 = vector.shape_cast %43 : vector<1xf32> to vector<1x1x1xf32>
    %45 = vector.extract %44[0, 0, 0] : f32 from vector<1x1x1xf32>
    %46 = vector.broadcast %45 : f32 to vector<1x1xf32>
    %c128_i32_14 = arith.constant 128 : i32
    %47 = arith.muli %arg1, %c128_i32_14 : i32
    %48 = tpu.assume_multiple %47, 128 : i32
    %c0_15 = arith.constant 0 : index
    %49 = arith.index_cast %48 : i32 to index
    %50 = vector.load %arg2[%c0_15, %49] : memref<8x128xf32, #tpu.memory_space<vmem>>, vector<8x128xf32>
    %cst_16 = arith.constant dense<0.000000e+00> : vector<8x128xf32>
    %51 = tpu.matmul %50, %14, %cst_16 {dimension_numbers = #tpu.dot_dimension_numbers<[1], [1], [0], [0], [0, 0, 1, 0], [], []>} : vector<8x128xf32>, vector<128x128xf32>, vector<8x128xf32> -> vector<8x128xf32>
    %c0_i32 = arith.constant 0 : i32
    %52 = arith.cmpi eq, %arg1, %c0_i32 : i32
    %53 = arith.extui %52 : i1 to i32
    %c0_i32_17 = arith.constant 0 : i32
    %54 = arith.cmpi ne, %53, %c0_i32_17 : i32
    scf.if %54 {
      %c0_22 = arith.constant 0 : index
      %c0_23 = arith.constant 0 : index
      %61 = vector.load %arg6[%c0_22, %c0_23] : memref<1x128xf32, #tpu.memory_space<vmem>>, vector<1x128xf32>
      %c0_24 = arith.constant 0 : index
      %c0_25 = arith.constant 0 : index
      %62 = vector.load %arg7[%c0_24, %c0_25] : memref<1x128xf32, #tpu.memory_space<vmem>>, vector<1x128xf32>
      %c0_26 = arith.constant 0 : index
      %c0_27 = arith.constant 0 : index
      %63 = vector.load %arg8[%c0_26, %c0_27] : memref<1x128xf32, #tpu.memory_space<vmem>>, vector<1x128xf32>
      %cst_28 = arith.constant 0.000000e+00 : f32
      %64 = vector.broadcast %cst_28 : f32 to vector<1x128xf32>
      %65 = arith.maximumf %62, %64 : vector<1x128xf32>
      %66 = math.absf %62 : vector<1x128xf32>
      %cst_29 = arith.constant 0.000000e+00 : f32
      %67 = vector.broadcast %cst_29 : f32 to vector<1x128xf32>
      %68 = arith.subf %67, %66 : vector<1x128xf32>
      %69 = math.exp %68 : vector<1x128xf32>
      %cst_30 = arith.constant 1.000000e+00 : f32
      %70 = vector.broadcast %cst_30 : f32 to vector<1x128xf32>
      %71 = arith.addf %70, %69 : vector<1x128xf32>
      %72 = math.log %71 : vector<1x128xf32>
      %73 = arith.addf %65, %72 : vector<1x128xf32>
      %74 = arith.mulf %73, %63 : vector<1x128xf32>
      %75 = arith.addf %61, %74 : vector<1x128xf32>
      %c0_31 = arith.constant 0 : index
      %c0_32 = arith.constant 0 : index
      %76 = vector.load %arg11[%c0_31, %c0_32] : memref<1x128xf32, #tpu.memory_space<vmem>>, vector<1x128xf32>
      tpu.vector_store %arg11[%c0_31, %c0_32], %75 {strides = array<i32>} : memref<1x128xf32, #tpu.memory_space<vmem>>, vector<1x128xf32>,
      %77 = math.log %73 : vector<1x128xf32>
      %78 = tpu.iota {dimensions = array<i32: 1>} : vector<1x128xi32>
      %c128_i32_33 = arith.constant 128 : i32
      %79 = arith.muli %arg0, %c128_i32_33 : i32
      %80 = vector.broadcast %79 : i32 to vector<1x128xi32>
      %81 = arith.addi %78, %80 : vector<1x128xi32>
      %c16_i32_34 = arith.constant 16 : i32
      %82 = vector.broadcast %c16_i32_34 : i32 to vector<1x128xi32>
      %83 = arith.cmpi slt, %81, %82 : vector<1x128xi32>
      %cst_35 = arith.constant 0.000000e+00 : f32
      %84 = vector.broadcast %cst_35 : f32 to vector<1x128xf32>
      %85 = arith.select %83, %77, %84 : vector<1x128xi1>, vector<1x128xf32>
      %86 = arith.mulf %75, %75 : vector<1x128xf32>
      %87 = vector.shape_cast %86 : vector<1x128xf32> to vector<1x1x128xf32>
      %cst_36 = arith.constant dense<0.000000e+00> : vector<1xf32>
      %88 = vector.multi_reduction <add>, %87, %cst_36 [1, 2] : vector<1x1x128xf32> to vector<1xf32>
      %89 = vector.shape_cast %88 : vector<1xf32> to vector<1x1x1xf32>
      %90 = vector.extract %89[0, 0, 0] : f32 from vector<1x1x1xf32>
      %91 = vector.broadcast %90 : f32 to vector<1x1xf32>
      %92 = arith.addf %37, %91 : vector<1x1xf32>
      %c0_37 = arith.constant 0 : index
      %c0_38 = arith.constant 0 : index
      %93 = vector.load %arg13[%c0_37, %c0_38] : memref<1x1xf32, #tpu.memory_space<vmem>>, vector<1x1xf32>
      tpu.vector_store %arg13[%c0_37, %c0_38], %92 {strides = array<i32>} : memref<1x1xf32, #tpu.memory_space<vmem>>, vector<1x1xf32>,
      %94 = arith.mulf %63, %63 : vector<1x128xf32>
      %cst_39 = arith.constant 5.000000e-01 : f32
      %95 = vector.broadcast %cst_39 : f32 to vector<1x128xf32>
      %96 = arith.mulf %95, %94 : vector<1x128xf32>
      %97 = arith.addf %85, %96 : vector<1x128xf32>
      %98 = vector.shape_cast %97 : vector<1x128xf32> to vector<1x1x128xf32>
      %cst_40 = arith.constant dense<0.000000e+00> : vector<1xf32>
      %99 = vector.multi_reduction <add>, %98, %cst_40 [1, 2] : vector<1x1x128xf32> to vector<1xf32>
      %100 = vector.shape_cast %99 : vector<1xf32> to vector<1x1x1xf32>
      %101 = vector.extract %100[0, 0, 0] : f32 from vector<1x1x1xf32>
      %102 = vector.broadcast %101 : f32 to vector<1x1xf32>
      %103 = arith.addf %46, %102 : vector<1x1xf32>
      %c0_41 = arith.constant 0 : index
      %c0_42 = arith.constant 0 : index
      %104 = vector.load %arg14[%c0_41, %c0_42] : memref<1x1xf32, #tpu.memory_space<vmem>>, vector<1x1xf32>
      tpu.vector_store %arg14[%c0_41, %c0_42], %103 {strides = array<i32>} : memref<1x1xf32, #tpu.memory_space<vmem>>, vector<1x1xf32>,
      %105 = vector.broadcast %75 : vector<1x128xf32> to vector<8x128xf32>
      %106 = arith.addf %51, %105 : vector<8x128xf32>
      %c0_43 = arith.constant 0 : index
      %c0_44 = arith.constant 0 : index
      %107 = vector.load %arg9[%c0_43, %c0_44] : memref<8x128xf32, #tpu.memory_space<vmem>>, vector<8x128xf32>
      tpu.vector_store %arg9[%c0_43, %c0_44], %106 {strides = array<i32>} : memref<8x128xf32, #tpu.memory_space<vmem>>, vector<8x128xf32>,
    } else {
    }
    %c0_i32_18 = arith.constant 0 : i32
    %55 = arith.cmpi ne, %arg1, %c0_i32_18 : i32
    %56 = arith.extui %55 : i1 to i32
    %c0_i32_19 = arith.constant 0 : i32
    %57 = arith.cmpi ne, %56, %c0_i32_19 : i32
    scf.if %57 {
      %c0_22 = arith.constant 0 : index
      %c0_23 = arith.constant 0 : index
      %61 = vector.load %arg13[%c0_22, %c0_23] : memref<1x1xf32, #tpu.memory_space<vmem>>, vector<1x1xf32>
      %62 = arith.addf %61, %37 : vector<1x1xf32>
      %c0_24 = arith.constant 0 : index
      %c0_25 = arith.constant 0 : index
      %63 = vector.load %arg13[%c0_24, %c0_25] : memref<1x1xf32, #tpu.memory_space<vmem>>, vector<1x1xf32>
      tpu.vector_store %arg13[%c0_24, %c0_25], %62 {strides = array<i32>} : memref<1x1xf32, #tpu.memory_space<vmem>>, vector<1x1xf32>,
      %c0_26 = arith.constant 0 : index
      %c0_27 = arith.constant 0 : index
      %64 = vector.load %arg14[%c0_26, %c0_27] : memref<1x1xf32, #tpu.memory_space<vmem>>, vector<1x1xf32>
      %65 = arith.addf %64, %46 : vector<1x1xf32>
      %c0_28 = arith.constant 0 : index
      %c0_29 = arith.constant 0 : index
      %66 = vector.load %arg14[%c0_28, %c0_29] : memref<1x1xf32, #tpu.memory_space<vmem>>, vector<1x1xf32>
      tpu.vector_store %arg14[%c0_28, %c0_29], %65 {strides = array<i32>} : memref<1x1xf32, #tpu.memory_space<vmem>>, vector<1x1xf32>,
      %c0_30 = arith.constant 0 : index
      %c0_31 = arith.constant 0 : index
      %67 = vector.load %arg9[%c0_30, %c0_31] : memref<8x128xf32, #tpu.memory_space<vmem>>, vector<8x128xf32>
      %68 = arith.addf %67, %51 : vector<8x128xf32>
      %c0_32 = arith.constant 0 : index
      %c0_33 = arith.constant 0 : index
      %69 = vector.load %arg9[%c0_32, %c0_33] : memref<8x128xf32, #tpu.memory_space<vmem>>, vector<8x128xf32>
      tpu.vector_store %arg9[%c0_32, %c0_33], %68 {strides = array<i32>} : memref<8x128xf32, #tpu.memory_space<vmem>>, vector<8x128xf32>,
    } else {
    }
    %c0_i32_20 = arith.constant 0 : i32
    %58 = arith.cmpi eq, %arg1, %c0_i32_20 : i32
    %59 = arith.extui %58 : i1 to i32
    %c0_i32_21 = arith.constant 0 : i32
    %60 = arith.cmpi ne, %59, %c0_i32_21 : i32
    scf.if %60 {
      %c0_22 = arith.constant 0 : index
      %c0_23 = arith.constant 0 : index
      %61 = vector.load %arg13[%c0_22, %c0_23] : memref<1x1xf32, #tpu.memory_space<vmem>>, vector<1x1xf32>
      %c0_24 = arith.constant 0 : index
      %c0_25 = arith.constant 0 : index
      %62 = vector.load %arg14[%c0_24, %c0_25] : memref<1x1xf32, #tpu.memory_space<vmem>>, vector<1x1xf32>
      %63 = tpu.iota {dimensions = array<i32: 0>} : vector<8x128xi32>
      %64 = tpu.iota {dimensions = array<i32: 1>} : vector<8x128xi32>
      %c0_i32_26 = arith.constant 0 : i32
      %65 = vector.broadcast %c0_i32_26 : i32 to vector<8x128xi32>
      %66 = arith.cmpi eq, %63, %65 : vector<8x128xi32>
      %c0_i32_27 = arith.constant 0 : i32
      %67 = vector.broadcast %c0_i32_27 : i32 to vector<8x128xi32>
      %68 = arith.cmpi eq, %64, %67 : vector<8x128xi32>
      %69 = arith.andi %66, %68 : vector<8x128xi1>
      %cst_28 = arith.constant 0.000000e+00 : f32
      %70 = vector.shape_cast %61 : vector<1x1xf32> to vector<1x1xf32>
      %71 = vector.broadcast %70 : vector<1x1xf32> to vector<8x128xf32>
      %72 = vector.broadcast %cst_28 : f32 to vector<8x128xf32>
      %73 = arith.select %69, %71, %72 : vector<8x128xi1>, vector<8x128xf32>
      %c1_i32 = arith.constant 1 : i32
      %74 = vector.broadcast %c1_i32 : i32 to vector<8x128xi32>
      %75 = arith.cmpi eq, %64, %74 : vector<8x128xi32>
      %76 = arith.andi %66, %75 : vector<8x128xi1>
      %cst_29 = arith.constant 0.000000e+00 : f32
      %77 = vector.shape_cast %62 : vector<1x1xf32> to vector<1x1xf32>
      %78 = vector.broadcast %77 : vector<1x1xf32> to vector<8x128xf32>
      %79 = vector.broadcast %cst_29 : f32 to vector<8x128xf32>
      %80 = arith.select %76, %78, %79 : vector<8x128xi1>, vector<8x128xf32>
      %81 = arith.addf %73, %80 : vector<8x128xf32>
      %c0_30 = arith.constant 0 : index
      %c0_31 = arith.constant 0 : index
      %82 = vector.load %arg12[%c0_30, %c0_31] : memref<8x128xf32, #tpu.memory_space<vmem>>, vector<8x128xf32>
      tpu.vector_store %arg12[%c0_30, %c0_31], %81 {strides = array<i32>} : memref<8x128xf32, #tpu.memory_space<vmem>>, vector<8x128xf32>,
    } else {
    }
    return
  }
  func.func @transform_0(%arg0: i32, %arg1: i32) -> (i32, i32) {
    %c0_i32 = arith.constant 0 : i32
    %c0_i32_0 = arith.constant 0 : i32
    %c0_i32_1 = arith.constant 0 : i32
    return %c0_i32, %c0_i32_0 : i32, i32
  }
  func.func @transform_1(%arg0: i32, %arg1: i32) -> (i32, i32) {
    %c0_i32 = arith.constant 0 : i32
    return %arg0, %arg1 : i32, i32
  }
  func.func @transform_2(%arg0: i32, %arg1: i32) -> (i32, i32) {
    %c0_i32 = arith.constant 0 : i32
    return %arg0, %arg1 : i32, i32
  }
  func.func @transform_3(%arg0: i32, %arg1: i32) -> (i32, i32) {
    %c0_i32 = arith.constant 0 : i32
    return %arg0, %arg1 : i32, i32
  }
  func.func @transform_4(%arg0: i32, %arg1: i32) -> (i32, i32) {
    %c0_i32 = arith.constant 0 : i32
    %c0_i32_0 = arith.constant 0 : i32
    return %c0_i32, %arg0 : i32, i32
  }
  func.func @transform_5(%arg0: i32, %arg1: i32) -> (i32, i32) {
    %c0_i32 = arith.constant 0 : i32
    %c0_i32_0 = arith.constant 0 : i32
    return %c0_i32, %arg0 : i32, i32
  }
  func.func @transform_6(%arg0: i32, %arg1: i32) -> (i32, i32) {
    %c0_i32 = arith.constant 0 : i32
    %c0_i32_0 = arith.constant 0 : i32
    return %c0_i32, %arg0 : i32, i32
  }
  func.func @transform_7(%arg0: i32, %arg1: i32) -> (i32, i32) {
    %c0_i32 = arith.constant 0 : i32
    %c0_i32_0 = arith.constant 0 : i32
    return %c0_i32, %arg0 : i32, i32
  }
  func.func @transform_8(%arg0: i32, %arg1: i32) -> (i32, i32) {
    %c0_i32 = arith.constant 0 : i32
    return %arg0, %arg1 : i32, i32
  }
  func.func @transform_9(%arg0: i32, %arg1: i32) -> (i32, i32) {
    %c0_i32 = arith.constant 0 : i32
    %c0_i32_0 = arith.constant 0 : i32
    return %c0_i32, %arg0 : i32, i32
  }
  func.func @transform_10(%arg0: i32, %arg1: i32) -> (i32, i32) {
    %c0_i32 = arith.constant 0 : i32
    %c0_i32_0 = arith.constant 0 : i32
    return %arg0, %c0_i32 : i32, i32
  }
}

</mosaic_0001>

<bundles_post_ra>
// kernel: tpu_custom_call.1
= control target key start
LH: loop header
LB: loop body
LE: loop exit
PB: predicated region body
PF: predicated region fallthrough
CT: control target
= control target key end

     0   :  { %16 = vsyncpa [#allocation5], 0  ;;  %s1663_s0 = inlined_call_operand.hbm [shape: f32[8,128], index: 0, kind: input, shape index: {}]   ;;  %s1664_s1 = inlined_call_operand.hbm [shape: f32[128,128], index: 1, kind: input, shape index: {}]   ;;  %s1665_s2 = inlined_call_operand.hbm [shape: f32[128,128], index: 2, kind: input, shape index: {}]   ;;  %s1666_s3 = inlined_call_operand.hbm [shape: f32[128,128], index: 3, kind: input, shape index: {}]   ;;  %s1667_s4 = inlined_call_operand.vmem [shape: f32[1,128], index: 4, kind: input, shape index: {}]   ;;  %s1668_s5 = inlined_call_operand.vmem [shape: f32[1,128], index: 5, kind: input, shape index: {}]   ;;  %s1669_s6 = inlined_call_operand.vmem [shape: f32[1,128], index: 6, kind: input, shape index: {}]   ;;  %s1670_s7 = inlined_call_operand.hbm [shape: f32[8,128], index: 7, kind: output, shape index: {0}]   ;;  %s1671_s8 = inlined_call_operand.hbm [shape: f32[128,128], index: 8, kind: output, shape index: {1}]   ;;  %s1672_s9 = inlined_call_operand.hbm [shape: f32[1,128], index: 9, kind: output, shape index: {2}]   ;;  %s1673_s10 = inlined_call_operand.hbm [shape: f32[8,128], index: 10, kind: output, shape index: {3}]  }
   0x1   :  { %17 = vsyncpa [#allocation8], 0 }
   0x2   :  { %18 = vsyncpa [#allocation11], 0 }
   0x3   :  { %19 = vsyncpa [#allocation6], 0 }
   0x4   :  { %20 = vsyncpa [#allocation14], 0 }
   0x5   :  { %21 = vsyncpa [#allocation17], 0  ;;  %s1170_s13 = smov [#allocation7]   ;;  %s982_s17 = scalar_lea.hbm %s1664_s1, 2048 }
   0x6   :  { %s37_s14 = sshll.u32 %s1170_s13, 4  ;;  %p983_p0 = scmp.ne.s32.totalorder %s1664_s1, %s982_s17  ;;  %s38_s14 = int_to_ptr.vmem [resolvable:$true] %s37_s14 }
   0x7   :  { %p986_p1 = scmp.lt.u32.totalorder %s982_s17, %s1664_s1 }
   0x9   :  { %p988_p2 = pnand %p986_p1, %p983_p0 }
   0xb   :  { %991 = shalt.err (!%p988_p2)
}
   0xc   :  { %s992_s22 = scalar_lea.vmem %s38_s14, 2048  ;;  %p997_p4 = scmp.lt.s32.totalorder %s38_s14, %s38_s14 }
   0xd   :  { %p993_p3 = scmp.ne.s32.totalorder %s38_s14, %s992_s22  ;;  %p998_p5 = scmp.lt.s32.totalorder %s992_s22, %s992_s22 }
   0xf   :  { %p999_p6 = por %p998_p5, %p997_p4 }
  0x11   :  { %p1000_p7 = pnand %p999_p6, %p993_p3 }
  0x13   :  { %1003 = shalt.err (!%p1000_p7)
}
  0x14   :  { %s1171_s23 = smov 128   ;;  %s1172_s24 = smov 8  }
  0x15   :  { %43 = dma.hbm_to_vmem [thread:$0]  %s1664_s1, 2048, %s38_s14, [#allocation8], %s1171_s23, %s1171_s23, %s1172_s24  }
  0x16   :  { %s1173_s27 = smov [#allocation4]   ;;  %s1174_s29 = smov [#allocation9]  }
  0x17   :  { %s28_s28 = sshll.u32 %s1173_s27, 4  ;;  %s49_s30 = sshll.u32 %s1174_s29, 4  ;;  %s29_s28 = int_to_ptr.vmem [resolvable:$true] %s28_s28  ;;  %s50_s30 = int_to_ptr.vmem [resolvable:$true] %s49_s30 }
  0x18   :  { %s1004_s13 = scalar_lea.hbm %s1663_s0, 128 }
  0x19   :  { %p1005_p8 = scmp.ne.s32.totalorder %s1663_s0, %s1004_s13  ;;  %p1008_p9 = scmp.lt.u32.totalorder %s1004_s13, %s1663_s0 }
  0x1b   :  { %p1010_p10 = pnand %p1008_p9, %p1005_p8 }
  0x1d   :  { %1013 = shalt.err (!%p1010_p10)
}
  0x1e   :  { %s1014_s1 = scalar_lea.vmem %s29_s28, 128  ;;  %p1019_p12 = scmp.lt.s32.totalorder %s29_s28, %s29_s28 }
  0x1f   :  { %p1015_p11 = scmp.ne.s32.totalorder %s29_s28, %s1014_s1  ;;  %p1020_p13 = scmp.lt.s32.totalorder %s1014_s1, %s1014_s1 }
  0x21   :  { %p1021_p0 = por %p1020_p13, %p1019_p12 }
  0x23   :  { %p1022_p1 = pnand %p1021_p0, %p1015_p11 }
  0x25   :  { %1025 = shalt.err (!%p1022_p1)
}
  0x26   :  { %31 = dma.hbm_to_vmem [thread:$0]  %s1663_s0, 128, %s29_s28, [#allocation5]  }
  0x27   :  { %s1026_s22 = scalar_lea.hbm %s1665_s2, 2048 }
  0x28   :  { %p1027_p2 = scmp.ne.s32.totalorder %s1665_s2, %s1026_s22  ;;  %p1030_p3 = scmp.lt.u32.totalorder %s1026_s22, %s1665_s2 }
  0x2a   :  { %p1032_p4 = pnand %p1030_p3, %p1027_p2 }
  0x2c   :  { %1035 = shalt.err (!%p1032_p4)
}
  0x2d   :  { %s1036_s11 = scalar_lea.vmem %s50_s30, 2048  ;;  %p1041_p6 = scmp.lt.s32.totalorder %s50_s30, %s50_s30 }
  0x2e   :  { %p1037_p5 = scmp.ne.s32.totalorder %s50_s30, %s1036_s11  ;;  %p1042_p7 = scmp.lt.s32.totalorder %s1036_s11, %s1036_s11 }
  0x30   :  { %p1043_p8 = por %p1042_p7, %p1041_p6 }
  0x32   :  { %p1044_p9 = pnand %p1043_p8, %p1037_p5 }
  0x34   :  { %1047 = shalt.err (!%p1044_p9)
}
  0x35   :  { %55 = dma.hbm_to_vmem [thread:$0]  %s1665_s2, 2048, %s50_s30, [#allocation8], %s1171_s23, %s1171_s23, %s1172_s24  }
  0x36   :  { %s1175_s12 = smov [#allocation10]   ;;  %s1048_s17 = scalar_lea.hbm %s1666_s3, 2048 }
  0x37   :  { %s61_s13 = sshll.u32 %s1175_s12, 4  ;;  %p1049_p10 = scmp.ne.s32.totalorder %s1666_s3, %s1048_s17  ;;  %s62_s13 = int_to_ptr.vmem [resolvable:$true] %s61_s13 }
  0x38   :  { %p1052_p11 = scmp.lt.u32.totalorder %s1048_s17, %s1666_s3 }
  0x3a   :  { %p1054_p12 = pnand %p1052_p11, %p1049_p10 }
  0x3c   :  { %1057 = shalt.err (!%p1054_p12)
}
  0x3d   :  { %s1058_s20 = scalar_lea.vmem %s62_s13, 2048  ;;  %p1063_p0 = scmp.lt.s32.totalorder %s62_s13, %s62_s13 }
  0x3e   :  { %p1059_p13 = scmp.ne.s32.totalorder %s62_s13, %s1058_s20  ;;  %p1064_p1 = scmp.lt.s32.totalorder %s1058_s20, %s1058_s20 }
  0x40   :  { %p1065_p2 = por %p1064_p1, %p1063_p0 }
  0x42   :  { %p1066_p3 = pnand %p1065_p2, %p1059_p13 }
  0x44   :  { %1069 = shalt.err (!%p1066_p3)
}
  0x45   :  { %67 = dma.hbm_to_vmem [thread:$0]  %s1666_s3, 2048, %s62_s13, [#allocation11], %s1171_s23, %s1171_s23, %s1172_s24  }
  0x46   :  { %1158 = dma.done.wait [#allocation5], 128  }
  0x47   :  { %1159 = vsyncadd [#allocation5], 4294967168 }
  0x48   :  { %1160 = dma.done.wait [#allocation8], 4096  }
  0x49   :  { %1161 = vsyncadd [#allocation8], 4294963200 }
  0x4a   :  { %1162 = dma.done.wait [#allocation11], 2048  }
  0x4b   :  { %1163 = vsyncadd [#allocation11], 4294965248  ;;  %v1176_v0 = vmov 0.0|0.0   ;;  %v1300_v1 = vld [vmem:[%s1668_s5] sm:$0x1]  ;;  %vm1177_vm0 = vmmov 0  }
  0x4c   :  { %860 = vmatprep.subr.bf16.mxu0 %v1176_v0  ;;  %v643_v2 = vand.u32 2147483647, %v1300_v1  ;;  %v1178_v5 = vmov 0.0   ;;  %v1303_v6 = vld [vmem:[#allocation9] sm:$0xff]  ;;  %v1305_v7 = vld [vmem:[#allocation9 + $0x8] sm:$0xff]  ;;  %v1307_v8 = vld [vmem:[#allocation9 + $0x10] sm:$0xff] }
  0x4d   :  { %857 = vmatprep.mubr.msk.f32.mxu0 %vm1177_vm0, %v1178_v5  ;;  %v1309_v9 = vld [vmem:[#allocation9 + $0x18] sm:$0xff]  ;;  %v1311_v10 = vld [vmem:[#allocation9 + $0x20] sm:$0xff]  ;;  %v1313_v11 = vld [vmem:[#allocation9 + $0x28] sm:$0xff]  ;;  %v150_v12 = vand.u32 2147483647, %v1303_v6  ;;  %v642_v32 = vmax.f32 %v1300_v1, 0.0 }
  0x4e   :  { %v644_v3 = vsub.f32 0.0, %v643_v2  ;;  %v151_v13 = vand.u32 2147483647, %v1305_v7  ;;  %v1317_v15 = vld [vmem:[#allocation9 + $0x30] sm:$0xff]  ;;  %v152_v16 = vand.u32 2147483647, %v1307_v8 }
  0x4f   :  { %v153_v17 = vand.u32 2147483647, %v1309_v9  ;;  %v1321_v19 = vld [vmem:[#allocation9 + $0x38] sm:$0xff]  ;;  %v154_v20 = vand.u32 2147483647, %v1311_v10  ;;  %v1324_v21 = vld [vmem:[#allocation9 + $0x40] sm:$0xff] }
  0x50   :  { %v645_v4 = vmul.f32 1.442695, %v644_v3  ;;  %v1326_v22 = vld [vmem:[#allocation9 + $0x48] sm:$0xff]  ;;  %v155_v23 = vand.u32 2147483647, %v1313_v11  ;;  %v1329_v24 = vld [vmem:[#allocation9 + $0x50] sm:$0xff] }
  0x51   :  { %v1331_v25 = vld [vmem:[#allocation9 + $0x58] sm:$0xff]  ;;  %v156_v26 = vand.u32 2147483647, %v1317_v15  ;;  %v166_v27 = vsub.f32 0.0, %v150_v12  ;;  %v167_v28 = vsub.f32 0.0, %v151_v13  ;;  %v168_v30 = vsub.f32 0.0, %v152_v16 }
  0x52   :  { %908 = vpow2.f32 %v645_v4  ;;  %v157_v29 = vand.u32 2147483647, %v1321_v19  ;;  %v169_v31 = vsub.f32 0.0, %v153_v17  ;;  %v158_v33 = vand.u32 2147483647, %v1324_v21  ;;  %v1338_v36 = vld [vmem:[#allocation9 + $0x60] sm:$0xff] }
  0x53   :  { %v159_v34 = vand.u32 2147483647, %v1326_v22  ;;  %v170_v35 = vsub.f32 0.0, %v154_v20  ;;  %v160_v37 = vand.u32 2147483647, %v1329_v24  ;;  %v171_v39 = vsub.f32 0.0, %v155_v23 }
  0x54   :  { %v161_v38 = vand.u32 2147483647, %v1331_v25  ;;  %v1342_v40 = vld [vmem:[#allocation9 + $0x68] sm:$0xff]  ;;  %v172_v41 = vsub.f32 0.0, %v156_v26  ;;  %v182_v42 = vmul.f32 1.442695, %v166_v27 }
  0x55   :  { %v184_v43 = vmul.f32 1.442695, %v167_v28  ;;  %v1344_v44 = vld [vmem:[#allocation9 + $0x70] sm:$0xff]  ;;  %v173_v45 = vsub.f32 0.0, %v157_v29  ;;  %v186_v46 = vmul.f32 1.442695, %v168_v30 }
  0x56   :  { %v188_v47 = vmul.f32 1.442695, %v169_v31  ;;  %v1346_v48 = vld [vmem:[#allocation9 + $0x78] sm:$0xff]  ;;  %v162_v49 = vand.u32 2147483647, %v1338_v36  ;;  %v174_v50 = vsub.f32 0.0, %v158_v33 }
  0x57   :  { %v190_v51 = vmul.f32 1.442695, %v170_v35  ;;  %v163_v52 = vand.u32 2147483647, %v1342_v40  ;;  %v175_v53 = vsub.f32 0.0, %v159_v34  ;;  %v176_v56 = vsub.f32 0.0, %v160_v37 }
  0x58   :  { %v192_v54 = vmul.f32 1.442695, %v171_v39  ;;  %v164_v55 = vand.u32 2147483647, %v1344_v44  ;;  %v194_v57 = vmul.f32 1.442695, %v172_v41 }
  0x59   :  { %v165_v58 = vand.u32 2147483647, %v1346_v48  ;;  %v177_v59 = vsub.f32 0.0, %v161_v38  ;;  %v196_v60 = vmul.f32 1.442695, %v173_v45  ;;  %v178_v62 = vsub.f32 0.0, %v162_v49 }
  0x5a   :  { %v198_v63 = vmul.f32 1.442695, %v174_v50  ;;  %v179_v2 = vsub.f32 0.0, %v163_v52  ;;  %v200_v3 = vmul.f32 1.442695, %v175_v53  ;;  %v180_v5 = vsub.f32 0.0, %v164_v55 }
  0x5b   :  { %v1355_v4 = vld [vmem:[%s1669_s6] sm:$0x1]  ;;  %v202_v12 = vmul.f32 1.442695, %v176_v56  ;;  %v204_v16 = vmul.f32 1.442695, %v177_v59 }
  0x5c   :  { %v909_v14 = vpop.eup %908  ;;  %v639_v17 = vld [vmem:[%s1667_s4] sm:$0x1]  ;;  %v208_v23 = vmul.f32 1.442695, %v179_v2  ;;  %v210_v27 = vmul.f32 1.442695, %v180_v5 }
  0x5d   :  { %v647_v18 = vadd.f32 1.0, %v909_v14  ;;  %v181_v14 = vsub.f32 0.0, %v165_v58  ;;  %vm660_vm1 = vcmask 1040384   ;;  %v134_v56 = vmax.f32 %v1303_v6, 0.0  ;;  %s1180_s11 = smov [#allocation13]  }
  0x5e   :  { %v135_v59 = vmax.f32 %v1305_v7, 0.0  ;;  %v139_v5 = vmax.f32 %v1313_v11, 0.0  ;;  %v140_v6 = vmax.f32 %v1317_v15, 0.0  ;;  %v141_v7 = vmax.f32 %v1321_v19, 0.0  ;;  %s760_s0 = sshll.u32 %s1180_s11, 4  ;;  %s761_s0 = int_to_ptr.vmem [resolvable:$true] %s760_s0 }
  0x5f   :  { %910 = vlog2.f32 %v647_v18  ;;  %v206_v18 = vmul.f32 1.442695, %v178_v62  ;;  %v212_v30 = vmul.f32 1.442695, %v181_v14  ;;  %vm673_vm4 = vcmask 0   ;;  %s1070_s28 = scalar_lea.vmem %s761_s0, 2048  ;;  %p1075_p5 = scmp.lt.s32.totalorder %s761_s0, %s761_s0 }
  0x60   :  { %912 = vpow2.f32 %v182_v42  ;;  %p1071_p4 = scmp.ne.s32.totalorder %s761_s0, %s1070_s28  ;;  %p1076_p6 = scmp.lt.s32.totalorder %s1070_s28, %s1070_s28 }
  0x61   :  { %914 = vpow2.f32 %v184_v43 }
  0x62   :  { %916 = vpow2.f32 %v186_v46  ;;  %p1077_p7 = por %p1076_p6, %p1075_p5 }
  0x63   :  { %918 = vpow2.f32 %v188_v47 }
  0x64   :  { %920 = vpow2.f32 %v190_v51  ;;  %p1078_p8 = pnand %p1077_p7, %p1071_p4 }
  0x65   :  { %922 = vpow2.f32 %v192_v54 }
  0x66   :  { %924 = vpow2.f32 %v194_v57 }
  0x67   :  { %926 = vpow2.f32 %v196_v60  ;;  %v136_v60 = vmax.f32 %v1307_v8, 0.0  ;;  %v142_v8 = vmax.f32 %v1324_v21, 0.0 }
  0x68   :  { %928 = vpow2.f32 %v198_v63  ;;  %v137_v63 = vmax.f32 %v1309_v9, 0.0  ;;  %v143_v9 = vmax.f32 %v1326_v22, 0.0 }
  0x69   :  { %v911_v61 = vpop.eup %910  ;;  %930 = vpow2.f32 %v200_v3 }
  0x6a   :  { %v649_v1 = vmul.f32 0.6931472, %v911_v61  ;;  %v913_v26 = vpop.eup %912  ;;  %932 = vpow2.f32 %v202_v12 }
  0x6b   :  { %v915_v28 = vpop.eup %914  ;;  %934 = vpow2.f32 %v204_v16 }
  0x6c   :  { %v1357_v13 = vadd.f32 %v649_v1, %v642_v32  ;;  %v917_v31 = vpop.eup %916  ;;  %936 = vpow2.f32 %v206_v18  ;;  %v214_v32 = vadd.f32 1.0, %v913_v26  ;;  %v215_v35 = vadd.f32 1.0, %v915_v28 }
  0x6d   :  { %v919_v33 = vpop.eup %918  ;;  %938 = vpow2.f32 %v208_v23  ;;  %v216_v38 = vadd.f32 1.0, %v917_v31  ;;  %v138_v1 = vmax.f32 %v1311_v10, 0.0  ;;  %v144_v10 = vmax.f32 %v1329_v24, 0.0 }
  0x6e   :  { %v651_v20 = vmul.f32 %v1357_v13, %v1355_v4  ;;  %v921_v37 = vpop.eup %920  ;;  %940 = vpow2.f32 %v210_v27  ;;  %v217_v42 = vadd.f32 1.0, %v919_v33  ;;  %v145_v23 = vmax.f32 %v1331_v25, 0.0 }
  0x6f   :  { %v923_v39 = vpop.eup %922  ;;  %942 = vpow2.f32 %v212_v30  ;;  %v218_v45 = vadd.f32 1.0, %v921_v37  ;;  %v1382_v30 = vld [vmem:[#allocation10] sm:$0xff]  ;;  %v146_v31 = vmax.f32 %v1338_v36, 0.0  ;;  %v148_v37 = vmax.f32 %v1344_v44, 0.0  ;;  %v99_v36 = vld [vmem:[#allocation7 + $0x68] sm:$0xff] }
  0x70   :  { %v1364_v29 = vadd.f32 %v651_v20, %v639_v17  ;;  %v925_v43 = vpop.eup %924  ;;  %944 = vlog2.f32 %v214_v32  ;;  %v219_v47 = vadd.f32 1.0, %v923_v39  ;;  %v147_v32 = vmax.f32 %v1342_v40, 0.0 }
  0x71   :  { %v927_v46 = vpop.eup %926  ;;  %946 = vlog2.f32 %v215_v35  ;;  %v220_v50 = vadd.f32 1.0, %v925_v43  ;;  %v1386_v35 = vld [vmem:[#allocation10 + $0x8] sm:$0xff]  ;;  %v1391_v43 = vld [vmem:[#allocation10 + $0x10] sm:$0xff]  ;;  %v358_v40 = vlaneseq  ;;  %v675_v44 = vmul.f32 %v1355_v4, %v1355_v4 }
  0x72   :  { %v659_v34 = vmul.f32 %v1364_v29, %v1364_v29  ;;  %653 = vst [vmem:[#allocation15] sm:$0x1] %v1364_v29  ;;  %v929_v49 = vpop.eup %928  ;;  %948 = vlog2.f32 %v216_v38  ;;  %v221_v52 = vadd.f32 1.0, %v927_v46 }
  0x73   :  { %v931_v51 = vpop.eup %930  ;;  %950 = vlog2.f32 %v217_v42  ;;  %v222_v54 = vadd.f32 1.0, %v929_v49  ;;  %v86_v42 = vld [vmem:[#allocation7] sm:$0xff] }
  0x74   :  { %v661_v41 = vsel %vm660_vm1, %v659_v34, 0.0  ;;  %v933_v53 = vpop.eup %932  ;;  %952 = vlog2.f32 %v218_v45  ;;  %v223_v57 = vadd.f32 1.0, %v931_v51  ;;  %v149_v45 = vmax.f32 %v1346_v48, 0.0  ;;  %v1396_v51 = vld [vmem:[#allocation10 + $0x18] sm:$0xff] }
  0x75   :  { %662 = vadd.xlane.f32.xlu1 %v661_v41  ;;  %v935_v55 = vpop.eup %934  ;;  %954 = vlog2.f32 %v219_v47  ;;  %v224_v61 = vadd.f32 1.0, %v933_v53 }
  0x76   :  { %v937_v58 = vpop.eup %936  ;;  %956 = vlog2.f32 %v220_v50  ;;  %v225_v2 = vadd.f32 1.0, %v935_v55  ;;  %v87_v50 = vld [vmem:[#allocation7 + $0x8] sm:$0xff] }
  0x77   :  { %v939_v62 = vpop.eup %938  ;;  %958 = vlog2.f32 %v221_v52  ;;  %v226_v12 = vadd.f32 1.0, %v937_v58 }
  0x78   :  { %v941_v3 = vpop.eup %940  ;;  %960 = vlog2.f32 %v222_v54  ;;  %v227_v16 = vadd.f32 1.0, %v939_v62 }
  0x79   :  { %v943_v14 = vpop.eup %942  ;;  %962 = vlog2.f32 %v223_v57  ;;  %v228_v18 = vadd.f32 1.0, %v941_v3  ;;  %v1400_v57 = vld [vmem:[#allocation10 + $0x20] sm:$0xff]  ;;  %v1405_v3 = vld [vmem:[#allocation10 + $0x28] sm:$0xff] }
  0x7a   :  { %v945_v17 = vpop.eup %944  ;;  %964 = vlog2.f32 %v224_v61  ;;  %v229_v26 = vadd.f32 1.0, %v943_v14 }
  0x7b   :  { %v947_v20 = vpop.eup %946  ;;  %v231_v27 = vmul.f32 0.6931472, %v945_v17  ;;  %966 = vlog2.f32 %v225_v2  ;;  %v89_v2 = vld [vmem:[#allocation7 + $0x18] sm:$0xff] }
  0x7c   :  { %v949_v28 = vpop.eup %948  ;;  %v233_v33 = vmul.f32 0.6931472, %v947_v20  ;;  %968 = vlog2.f32 %v226_v12  ;;  %v1410_v20 = vld [vmem:[#allocation10 + $0x30] sm:$0xff] }
  0x7d   :  { %v951_v34 = vpop.eup %950  ;;  %v235_v38 = vmul.f32 0.6931472, %v949_v28  ;;  %970 = vlog2.f32 %v227_v16  ;;  %v1389_v39 = vadd.f32 %v231_v27, %v134_v56  ;;  %v88_v56 = vld [vmem:[#allocation7 + $0x10] sm:$0xff] }
  0x7e   :  { %v953_v41 = vpop.eup %952  ;;  %v237_v46 = vmul.f32 0.6931472, %v951_v34  ;;  %972 = vlog2.f32 %v228_v18  ;;  %v1394_v47 = vadd.f32 %v233_v33, %v135_v59  ;;  %v90_v18 = vld [vmem:[#allocation7 + $0x20] sm:$0xff]  ;;  %v91_v33 = vld [vmem:[#allocation7 + $0x28] sm:$0xff]  ;;  %v1417_v34 = vld [vmem:[#allocation10 + $0x38] sm:$0xff] }
  0x7f   :  { %v955_v49 = vpop.eup %954  ;;  %v239_v52 = vmul.f32 0.6931472, %v953_v41  ;;  %974 = vlog2.f32 %v229_v26  ;;  %v264_v53 = vadd.f32 %v235_v38, %v136_v60  ;;  %v278_v54 = vmul.f32 %v1389_v39, %v1382_v30 }
  0x80   :  { %v957_v55 = vpop.eup %956  ;;  %v241_v58 = vmul.f32 0.6931472, %v955_v49  ;;  %v265_v61 = vadd.f32 %v237_v46, %v137_v63  ;;  %v279_v59 = vmul.f32 %v1394_v47, %v1386_v35  ;;  %976 = vlog2.f32 %v1357_v13  ;;  %v1425_v46 = vld [vmem:[#allocation10 + $0x40] sm:$0xff] }
  0x81   :  { %v959_v62 = vpop.eup %958  ;;  %v243_v12 = vmul.f32 0.6931472, %v957_v55  ;;  %v266_v60 = vadd.f32 %v239_v52, %v138_v1  ;;  %v280_v14 = vmul.f32 %v264_v53, %v1391_v43  ;;  %v1408_v16 = vadd.f32 %v278_v54, %v86_v42  ;;  %v1433_v54 = vld [vmem:[#allocation10 + $0x48] sm:$0xff] }
  0x82   :  { %v961_v17 = vpop.eup %960  ;;  %v245_v63 = vmul.f32 0.6931472, %v959_v62  ;;  %v267_v26 = vadd.f32 %v241_v58, %v139_v5  ;;  %v281_v13 = vmul.f32 %v265_v61, %v1396_v51  ;;  %v1415_v27 = vadd.f32 %v279_v59, %v87_v50  ;;  %v92_v5 = vld [vmem:[#allocation7 + $0x30] sm:$0xff] }
  0x83   :  { %v963_v28 = vpop.eup %962  ;;  %v247_v1 = vmul.f32 0.6931472, %v961_v17  ;;  %v268_v38 = vadd.f32 %v243_v12, %v140_v6  ;;  %v282_v41 = vmul.f32 %v266_v60, %v1400_v57  ;;  %v1422_v42 = vadd.f32 %v280_v14, %v88_v56  ;;  %310 = vst [vmem:[#allocation13] sm:$0xff] %v1408_v16  ;;  %v93_v6 = vld [vmem:[#allocation7 + $0x38] sm:$0xff]  ;;  %v1441_v59 = vld [vmem:[#allocation10 + $0x50] sm:$0xff] }
  0x84   :  { %v965_v11 = vpop.eup %964  ;;  %v249_v49 = vmul.f32 0.6931472, %v963_v28  ;;  %v269_v50 = vadd.f32 %v245_v63, %v141_v7  ;;  %v283_v52 = vmul.f32 %v267_v26, %v1405_v3  ;;  %v1430_v53 = vadd.f32 %v281_v13, %v89_v2  ;;  %311 = vst [vmem:[#allocation13 + $0x8] sm:$0xff] %v1415_v27  ;;  %v94_v7 = vld [vmem:[#allocation7 + $0x40] sm:$0xff]  ;;  %v1449_v14 = vld [vmem:[#allocation10 + $0x58] sm:$0xff] }
  0x85   :  { %v967_v15 = vpop.eup %966  ;;  %v251_v55 = vmul.f32 0.6931472, %v965_v11  ;;  %v270_v56 = vadd.f32 %v247_v1, %v142_v8  ;;  %v284_v58 = vmul.f32 %v268_v38, %v1410_v20  ;;  %v1438_v61 = vadd.f32 %v282_v41, %v90_v18  ;;  %312 = vst [vmem:[#allocation13 + $0x10] sm:$0xff] %v1422_v42  ;;  %v95_v8 = vld [vmem:[#allocation7 + $0x48] sm:$0xff]  ;;  %v1457_v13 = vld [vmem:[#allocation10 + $0x60] sm:$0xff] }
  0x86   :  { %v969_v19 = vpop.eup %968  ;;  %v253_v62 = vmul.f32 0.6931472, %v967_v15  ;;  %v271_v2 = vadd.f32 %v249_v49, %v143_v9  ;;  %v285_v12 = vmul.f32 %v269_v50, %v1417_v34  ;;  %v1446_v60 = vadd.f32 %v283_v52, %v91_v33  ;;  %313 = vst [vmem:[#allocation13 + $0x18] sm:$0xff] %v1430_v53  ;;  %v96_v9 = vld [vmem:[#allocation7 + $0x50] sm:$0xff]  ;;  %v1465_v41 = vld [vmem:[#allocation10 + $0x68] sm:$0xff] }
  0x87   :  { %v971_v21 = vpop.eup %970  ;;  %v255_v17 = vmul.f32 0.6931472, %v969_v19  ;;  %v272_v18 = vadd.f32 %v251_v55, %v144_v10  ;;  %v286_v63 = vmul.f32 %v270_v56, %v1425_v46  ;;  %v1454_v26 = vadd.f32 %v284_v58, %v92_v5  ;;  %314 = vst [vmem:[#allocation13 + $0x20] sm:$0xff] %v1438_v61  ;;  %v97_v10 = vld [vmem:[#allocation7 + $0x58] sm:$0xff]  ;;  %v1473_v52 = vld [vmem:[#allocation10 + $0x70] sm:$0xff] }
  0x88   :  { %v973_v22 = vpop.eup %972  ;;  %v257_v28 = vmul.f32 0.6931472, %v971_v21  ;;  %v273_v33 = vadd.f32 %v253_v62, %v145_v23  ;;  %v287_v1 = vmul.f32 %v271_v2, %v1433_v54  ;;  %v1462_v38 = vadd.f32 %v285_v12, %v93_v6  ;;  %315 = vst [vmem:[#allocation13 + $0x28] sm:$0xff] %v1446_v60  ;;  %v98_v23 = vld [vmem:[#allocation7 + $0x60] sm:$0xff] }
  0x89   :  { %v975_v24 = vpop.eup %974  ;;  %v259_v11 = vmul.f32 0.6931472, %v973_v22  ;;  %v274_v5 = vadd.f32 %v255_v17, %v146_v31  ;;  %v288_v49 = vmul.f32 %v272_v18, %v1441_v59  ;;  %v1470_v50 = vadd.f32 %v286_v63, %v94_v7  ;;  %316 = vst [vmem:[#allocation13 + $0x30] sm:$0xff] %v1454_v26  ;;  %v1481_v31 = vld [vmem:[#allocation10 + $0x78] sm:$0xff] }
  0x8a   :  { %v977_v25 = vpop.eup %976  ;;  %v261_v15 = vmul.f32 0.6931472, %v975_v24  ;;  %v275_v6 = vadd.f32 %v257_v28, %v147_v32  ;;  %v289_v55 = vmul.f32 %v273_v33, %v1449_v14  ;;  %v1478_v56 = vadd.f32 %v287_v1, %v95_v8  ;;  %317 = vst [vmem:[#allocation13 + $0x38] sm:$0xff] %v1462_v38  ;;  %v100_v32 = vld [vmem:[#allocation7 + $0x70] sm:$0xff] }
  0x8b   :  { %v276_v58 = vadd.f32 %v259_v11, %v148_v37  ;;  %v290_v19 = vmul.f32 %v274_v5, %v1457_v13  ;;  %v1486_v7 = vadd.f32 %v288_v49, %v96_v9  ;;  %318 = vst [vmem:[#allocation13 + $0x40] sm:$0xff] %v1470_v50  ;;  %v101_v37 = vld [vmem:[#allocation7 + $0x78] sm:$0xff]  ;;  %v447_v48 = vmul.f32 %v1408_v16, %v1408_v16 }
  0x8c   :  { %v277_v62 = vadd.f32 %v261_v15, %v149_v45  ;;  %v291_v2 = vmul.f32 %v275_v6, %v1465_v41  ;;  %v1492_v12 = vadd.f32 %v289_v55, %v97_v10  ;;  %319 = vst [vmem:[#allocation13 + $0x48] sm:$0xff] %v1478_v56  ;;  %v448_v45 = vmul.f32 %v1415_v27, %v1415_v27 }
  0x8d   :  { %v292_v21 = vmul.f32 %v276_v58, %v1473_v52  ;;  %v1498_v8 = vadd.f32 %v290_v19, %v98_v23  ;;  %320 = vst [vmem:[#allocation13 + $0x50] sm:$0xff] %v1486_v7  ;;  %v449_v63 = vmul.f32 %v1422_v42, %v1422_v42  ;;  %v1515_v22 = vand.u32 127, %v358_v40 }
  0x8e   :  { %v293_v17 = vmul.f32 %v277_v62, %v1481_v31  ;;  %v1506_v18 = vadd.f32 %v291_v2, %v99_v36  ;;  %321 = vst [vmem:[#allocation13 + $0x58] sm:$0xff] %v1492_v12  ;;  %v450_v28 = vmul.f32 %v1430_v53, %v1430_v53  ;;  %v463_v33 = vadd.f32 %v448_v45, %v447_v48 }
  0x8f   :  { %v1509_v4 = vadd.f32 %v292_v21, %v100_v32  ;;  %322 = vst [vmem:[#allocation13 + $0x60] sm:$0xff] %v1498_v8  ;;  %vm657_vm2 = vcmp.lt.s32.totalorder %v1515_v22, 16  ;;  %v676_v1 = vmul.f32 0.5, %v675_v44  ;;  %v655_v24 = vmul.f32 0.6931472, %v977_v25 }
  0x90   :  { %v1517_v9 = vadd.f32 %v293_v17, %v101_v37  ;;  %323 = vst [vmem:[#allocation13 + $0x68] sm:$0xff] %v1506_v18  ;;  %978 = vlog2.f32 %v1389_v39  ;;  %v861_v10 = vpack.c.bf16 %v1415_v27, %v1408_v16  ;;  %v451_v11 = vmul.f32 %v1438_v61, %v1438_v61 }
  0x91   :  { %324 = vst [vmem:[#allocation13 + $0x70] sm:$0xff] %v1509_v4  ;;  %v464_v5 = vadd.f32 %v463_v33, %v449_v63  ;;  %980 = vlog2.f32 %v1394_v47  ;;  %v658_v49 = vsel %vm657_vm2, %v655_v24, 0.0  ;;  %v452_v23 = vmul.f32 %v1446_v60, %v1446_v60 }
  0x92   :  { %325 = vst [vmem:[#allocation13 + $0x78] sm:$0xff] %v1517_v9  ;;  %862 = vmatpush3.bf16.xpose.msra.mxu0 %v861_v10  ;;  %v677_v6 = vadd.f32 %v676_v1, %v658_v49  ;;  %v453_v39 = vmul.f32 %v1454_v26, %v1454_v26  ;;  %v488_v27 = vmul.f32 %v1382_v30, %v1382_v30  ;;  %vm414_vm3 = vcmp.lt.s32.totalorder %v1515_v22, 32 }
  0x93   :  { %v465_v15 = vadd.f32 %v464_v5, %v450_v28  ;;  %863 = vmatprep.subr.bf16.mxu0 %v1176_v0  ;;  %v864_v47 = vpack.c.bf16 %v1430_v53, %v1422_v42  ;;  %v454_v55 = vmul.f32 %v1462_v38, %v1462_v38  ;;  %v489_v58 = vmul.f32 %v1386_v35, %v1386_v35 }
  0x94   :  { %v678_v16 = vsel %vm660_vm1, %v677_v6, 0.0  ;;  %v455_v19 = vmul.f32 %v1470_v50, %v1470_v50  ;;  %v490_v30 = vmul.f32 %v1391_v43, %v1391_v43  ;;  %v504_v2 = vmul.f32 0.5, %v488_v27 }
  0x95   :  { %v466_v25 = vadd.f32 %v465_v15, %v451_v11  ;;  %679 = vadd.xlane.f32.xlu1 %v678_v16  ;;  %v456_v53 = vmul.f32 %v1478_v56, %v1478_v56  ;;  %v505_v21 = vmul.f32 0.5, %v489_v58  ;;  %v457_v48 = vmul.f32 %v1486_v7, %v1486_v7 }
  0x96   :  { %v491_v43 = vmul.f32 %v1396_v51, %v1396_v51  ;;  %v492_v33 = vmul.f32 %v1400_v57, %v1400_v57  ;;  %v867_v1 = vpack.c.bf16 %v1446_v60, %v1438_v61  ;;  %v458_v24 = vmul.f32 %v1492_v12, %v1492_v12 }
  0x97   :  { %v467_v36 = vadd.f32 %v466_v25, %v452_v23  ;;  %v506_v11 = vmul.f32 0.5, %v490_v30  ;;  %v493_v49 = vmul.f32 %v1405_v3, %v1405_v3  ;;  %v459_v51 = vmul.f32 %v1498_v8, %v1498_v8 }
  0x98   :  { %v507_v6 = vmul.f32 0.5, %v491_v43  ;;  %v494_v57 = vmul.f32 %v1410_v20, %v1410_v20  ;;  %v460_v61 = vmul.f32 %v1506_v18, %v1506_v18  ;;  %v508_v25 = vmul.f32 0.5, %v492_v33 }
  0x99   :  { %v468_v32 = vadd.f32 %v467_v36, %v453_v39  ;;  %v495_v3 = vmul.f32 %v1417_v34, %v1417_v34  ;;  %v461_v16 = vmul.f32 %v1509_v4, %v1509_v4  ;;  %v496_v20 = vmul.f32 %v1425_v46, %v1425_v46 }
  0x9a   :  { %v979_v62 = vpop.eup %978  ;;  %865 = vmatpush3.bf16.xpose.msra.mxu0 %v864_v47  ;;  %v509_v47 = vmul.f32 0.5, %v493_v49  ;;  %v870_v36 = vpack.c.bf16 %v1462_v38, %v1454_v26  ;;  %v462_v58 = vmul.f32 %v1517_v9, %v1517_v9  ;;  %v497_v34 = vmul.f32 %v1433_v54, %v1433_v54 }
  0x9b   :  { %v981_v42 = vpop.eup %980  ;;  %v469_v44 = vadd.f32 %v468_v32, %v454_v55  ;;  %v327_v37 = vmul.f32 0.6931472, %v979_v62  ;;  %866 = vmatprep.subr.bf16.mxu0 %v1176_v0  ;;  %v510_v32 = vmul.f32 0.5, %v494_v57  ;;  %v498_v46 = vmul.f32 %v1441_v59, %v1441_v59 }
  0x9c   :  { %v329_v35 = vmul.f32 0.6931472, %v981_v42  ;;  %v499_v26 = vmul.f32 %v1449_v14, %v1449_v14  ;;  %v513_v38 = vmul.f32 0.5, %v497_v34  ;;  %v873_v54 = vpack.c.bf16 %v1478_v56, %v1470_v50 }
  0x9d   :  { %v470_v45 = vadd.f32 %v469_v44, %v455_v19  ;;  %v431_v17 = vsel %vm414_vm3, %v327_v37, 0.0  ;;  %v512_v44 = vmul.f32 0.5, %v496_v20  ;;  %v501_v59 = vmul.f32 %v1465_v41, %v1465_v41 }
  0x9e   :  { %v432_v63 = vsel %vm414_vm3, %v329_v35, 0.0  ;;  %v520_v28 = vadd.f32 %v504_v2, %v431_v17  ;;  %v511_v2 = vmul.f32 0.5, %v495_v3  ;;  %v500_v35 = vmul.f32 %v1457_v13, %v1457_v13 }
  0x9f   :  { %v471_v10 = vadd.f32 %v470_v45, %v456_v53  ;;  %v521_v5 = vadd.f32 %v505_v21, %v432_v63  ;;  %v515_v17 = vmul.f32 0.5, %v499_v26  ;;  %v502_v63 = vmul.f32 %v1473_v52, %v1473_v52 }
  0xa0   :  { %v516_v14 = vmul.f32 0.5, %v500_v35  ;;  %v503_v50 = vmul.f32 %v1481_v31, %v1481_v31  ;;  %v517_v56 = vmul.f32 0.5, %v501_v59  ;;  %v876_v33 = vpack.c.bf16 %v1492_v12, %v1486_v7  ;;  %v564_v7 = vld [vmem:[#allocation4] sm:$0xff] }
  0xa1   :  { %v472_v23 = vadd.f32 %v471_v10, %v457_v48  ;;  %v536_v15 = vadd.f32 %v521_v5, %v520_v28  ;;  %v514_v48 = vmul.f32 0.5, %v498_v46  ;;  %v879_v5 = vpack.c.bf16 %v1506_v18, %v1498_v8 }
  0xa2   :  { %868 = vmatpush3.bf16.xpose.msra.mxu0 %v867_v1  ;;  %v518_v1 = vmul.f32 0.5, %v502_v63  ;;  %v882_v31 = vpack.c.bf16 %v1517_v9, %v1509_v4  ;;  %v1179_v12 = vmov 0  }
  0xa3   :  { %v473_v60 = vadd.f32 %v472_v23, %v458_v24  ;;  %v537_v39 = vadd.f32 %v536_v15, %v506_v11  ;;  %869 = vmatprep.subr.bf16.mxu0 %v1176_v0  ;;  %v519_v24 = vmul.f32 0.5, %v503_v50  ;;  %907 = vset.pattern.permute.xlu1 %v1179_v12 }
  0xa4   :  { %906 = vset.pattern.permute.xlu0 %v1179_v12 }
  0xa5   :  { %v474_v27 = vadd.f32 %v473_v60, %v459_v51  ;;  %v538_v55 = vadd.f32 %v537_v39, %v507_v6 }
  0xa7   :  { %v475_v19 = vadd.f32 %v474_v27, %v460_v61  ;;  %v539_v62 = vadd.f32 %v538_v55, %v508_v25 }
  0xa9   :  { %v476_v30 = vadd.f32 %v475_v19, %v461_v16  ;;  %v540_v42 = vadd.f32 %v539_v62, %v509_v47 }
  0xaa   :  { %871 = vmatpush3.bf16.xpose.msra.mxu0 %v870_v36 }
  0xab   :  { %v477_v53 = vadd.f32 %v476_v30, %v462_v58  ;;  %v541_v37 = vadd.f32 %v540_v42, %v510_v32  ;;  %872 = vmatprep.subr.bf16.mxu0 %v1176_v0 }
  0xad   :  { %478 = vadd.xlane.f32.xlu0 %v477_v53  ;;  %v542_v21 = vadd.f32 %v541_v37, %v511_v2 }
  0xaf   :  { %v543_v45 = vadd.f32 %v542_v21, %v512_v44  ;;  %v359_v21 = vshrl.u32 %v358_v40, 7 }
  0xb1   :  { %v544_v43 = vadd.f32 %v543_v45, %v513_v38 }
  0xb2   :  { %874 = vmatpush3.bf16.xpose.msra.mxu0 %v873_v54 }
  0xb3   :  { %v545_v28 = vadd.f32 %v544_v43, %v514_v48  ;;  %875 = vmatprep.subr.bf16.mxu0 %v1176_v0 }
  0xb5   :  { %v546_v13 = vadd.f32 %v545_v28, %v515_v17 }
  0xb7   :  { %v547_v41 = vadd.f32 %v546_v13, %v516_v14 }
  0xb9   :  { %v548_v10 = vadd.f32 %v547_v41, %v517_v56 }
  0xba   :  { %877 = vmatpush3.bf16.xpose.msra.mxu0 %v876_v33 }
  0xbb   :  { %v549_v11 = vadd.f32 %v548_v10, %v518_v1  ;;  %878 = vmatprep.subr.bf16.mxu0 %v1176_v0 }
  0xbd   :  { %v550_v52 = vadd.f32 %v549_v11, %v519_v24 }
  0xbf   :  { %551 = vadd.xlane.f32.xlu0 %v550_v52 }
  0xc2   :  { %880 = vmatpush3.bf16.xpose.msra.mxu0 %v879_v5 }
  0xc3   :  { %881 = vmatprep.subr.bf16.mxu0 %v1176_v0 }
  0xca   :  { %883 = vmatpush3.bf16.xpose.msra.mxu0 %v882_v31 }
  0xd1   :  { %858 = vmatmul.mubr.f32.vlgmr.msra.gmra.mrb[0].mxu0 %v564_v7 }
 0x102   :  { %v663_v23 = vpop.xlane.xlu1 %662 }
 0x103   :  { %v664_v61 = vrot.slane %v663_v23, 4 }
 0x105   :  { %v665_v39 = vadd.f32 %v664_v61, %v663_v23 }
 0x107   :  { %v666_v9 = vrot.slane %v665_v39, 2 }
 0x109   :  { %v667_v47 = vadd.f32 %v666_v9, %v665_v39 }
 0x10b   :  { %v668_v58 = vrot.slane %v667_v47, 1 }
 0x10d   :  { %v669_v30 = vadd.f32 %v668_v58, %v667_v47 }
 0x122   :  { %v680_v8 = vpop.xlane.xlu1 %679 }
 0x123   :  { %v681_v60 = vrot.slane %v680_v8, 4 }
 0x125   :  { %v682_v4 = vadd.f32 %v681_v60, %v680_v8 }
 0x127   :  { %v683_v3 = vrot.slane %v682_v4, 2 }
 0x129   :  { %v684_v20 = vadd.f32 %v683_v3, %v682_v4 }
 0x12b   :  { %v685_v32 = vrot.slane %v684_v20, 1 }
 0x12d   :  { %v686_v34 = vadd.f32 %v685_v32, %v684_v20 }
 0x13a   :  { %v479_v49 = vpop.xlane.xlu0 %478 }
 0x13b   :  { %v480_v51 = vrot.slane %v479_v49, 4 }
 0x13d   :  { %v481_v15 = vadd.f32 %v480_v51, %v479_v49 }
 0x13f   :  { %v482_v6 = vrot.slane %v481_v15, 2 }
 0x141   :  { %v483_v57 = vadd.f32 %v482_v6, %v481_v15 }
 0x143   :  { %v484_v18 = vrot.slane %v483_v57, 1 }
 0x145   :  { %v485_v0 = vadd.f32 %v484_v18, %v483_v57 }
 0x147   :  { %884 = vpush %v485_v0 }
 0x14c   :  { %v552_v25 = vpop.xlane.xlu0 %551 }
 0x14d   :  { %v553_v16 = vrot.slane %v552_v25, 4 }
 0x14f   :  { %v554_v27 = vadd.f32 %v553_v16, %v552_v25 }
 0x151   :  { %v555_v55 = vrot.slane %v554_v27, 2 }
 0x153   :  { %v556_v36 = vadd.f32 %v555_v55, %v554_v27 }
 0x155   :  { %v557_v19 = vrot.slane %v556_v36, 1 }
 0x157   :  { %v558_v62 = vadd.f32 %v557_v19, %v556_v36 }
 0x159   :  { %886 = vpush %v558_v62 }
 0x15a   :  { %888 = vpush %v669_v30 }
 0x15b   :  { %890 = vpush %v686_v34 }
 0x178   :  { %s885_s4 = spop %884 }
 0x179   :  { %v487_v42 = vstv %s885_s4 }
 0x18a   :  { %s887_s6 = spop %886 }
 0x18b   :  { %v560_v2 = vstv %s887_s6  ;;  %s889_s27 = spop %888 }
 0x18c   :  { %v671_v53 = vstv %s889_s27  ;;  %s891_s29 = spop %890 }
 0x18d   :  { %v672_v46 = vadd.f32 %v671_v53, %v487_v42  ;;  %v688_v44 = vstv %s891_s29 }
 0x18e   :  { %v689_v37 = vadd.f32 %v688_v44, %v560_v2 }
 0x18f   :  { %674 = vst.msk [vmem:[#allocation2] sm:$0x1] %vm673_vm4, %v672_v46 }
 0x190   :  { %690 = vst.msk [vmem:[#allocation3] sm:$0x1] %vm673_vm4, %v689_v37 }
 0x196   :  { %v806_v26 = vld [vmem:[#allocation2] ss:$0 sm:$0xff] }
 0x197   :  { %727 = vperm.xlu0 %906, %v806_v26   ;;  %v807_v38 = vld [vmem:[#allocation3] ss:$0 sm:$0xff] }
 0x198   :  { %739 = vperm.xlu1 %907, %v807_v38  }
 0x199   :  { %1081 = shalt.err (!%p1078_p8)
}
 0x19a   :  { %s1082_s15 = scalar_lea.hbm %s1671_s8, 2048 }
 0x19b   :  { %p1083_p9 = scmp.ne.s32.totalorder %s1671_s8, %s1082_s15  ;;  %p1086_p10 = scmp.lt.u32.totalorder %s1082_s15, %s1671_s8 }
 0x19d   :  { %p1088_p11 = pnand %p1086_p10, %p1083_p9 }
 0x19f   :  { %1091 = shalt.err (!%p1088_p11)
}
 0x1a0   :  { %766 = dma.vmem_to_hbm [thread:$0]  %s761_s0, 2048, %s1671_s8, [#allocation14], %s1171_s23, %s1171_s23, %s1172_s24   ;;  %v694_v40 = vsub.s32 0, %v359_v21 }
 0x1a1   :  { %s1181_s20 = smov [#allocation15]  }
 0x1a2   :  { %s773_s2 = sshll.u32 %s1181_s20, 4  ;;  %s774_s2 = int_to_ptr.vmem [resolvable:$true] %s773_s2 }
 0x1a3   :  { %s1092_s30 = scalar_lea.vmem %s774_s2, 16  ;;  %s1096_s21 = scalar_lea.vmem %s774_s2, 32 }
 0x1a4   :  { %p1093_p12 = scmp.ne.s32.totalorder %s774_s2, %s1092_s30  ;;  %p1097_p13 = scmp.lt.s32.totalorder %s774_s2, %s774_s2 }
 0x1a5   :  { %p1098_p0 = scmp.lt.s32.totalorder %s1096_s21, %s1092_s30 }
 0x1a7   :  { %p1099_p1 = por %p1098_p0, %p1097_p13 }
 0x1a9   :  { %p1100_p2 = pnand %p1099_p1, %p1093_p12 }
 0x1ab   :  { %1103 = shalt.err (!%p1100_p2)
}
 0x1ac   :  { %s1104_s5 = scalar_lea.hbm %s1672_s9, 16 }
 0x1ad   :  { %p1105_p3 = scmp.ne.s32.totalorder %s1672_s9, %s1104_s5  ;;  %p1108_p4 = scmp.lt.u32.totalorder %s1104_s5, %s1672_s9 }
 0x1af   :  { %p1110_p5 = pnand %p1108_p4, %p1105_p3 }
 0x1b1   :  { %1113 = shalt.err (!%p1110_p5)
}
 0x1b2   :  { %776 = dma.vmem_to_hbm [thread:$0]  %s774_s2, 16, %s1672_s9, [#allocation14]   ;;  %v695_v54 = vrot.slane %v1364_v29, %v694_v40  ;;  %v631_v35 = vpop.f32.mrb[0].mxu0 }
 0x1b3   :  { %s1182_s6 = smov [#allocation12]   ;;  %v859_v45 = vpop.f32.mrb[1].mxu0 }
 0x1b4   :  { %s751_s27 = sshll.u32 %s1182_s6, 4  ;;  %v697_v48 = vadd.f32 %v695_v54, %v631_v35  ;;  %s752_s27 = int_to_ptr.vmem [resolvable:$true] %s751_s27 }
 0x1b5   :  { %s1114_s29 = scalar_lea.vmem %s752_s27, 128  ;;  %p1119_p7 = scmp.lt.s32.totalorder %s752_s27, %s752_s27 }
 0x1b6   :  { %698 = vst [vmem:[#allocation12] sm:$0xff] %v697_v48  ;;  %p1115_p6 = scmp.ne.s32.totalorder %s752_s27, %s1114_s29  ;;  %p1120_p8 = scmp.lt.s32.totalorder %s1114_s29, %s1114_s29 }
 0x1b8   :  { %p1121_p9 = por %p1120_p8, %p1119_p7 }
 0x1ba   :  { %p1122_p10 = pnand %p1121_p9, %p1115_p6 }
 0x1bc   :  { %1125 = shalt.err (!%p1122_p10)
}
 0x1bd   :  { %s1126_s9 = scalar_lea.hbm %s1670_s7, 128 }
 0x1be   :  { %p1127_p11 = scmp.ne.s32.totalorder %s1670_s7, %s1126_s9  ;;  %p1130_p12 = scmp.lt.u32.totalorder %s1126_s9, %s1670_s7 }
 0x1c0   :  { %p1132_p13 = pnand %p1130_p12, %p1127_p11 }
 0x1c2   :  { %1135 = shalt.err (!%p1132_p13)
}
 0x1c3   :  { %754 = dma.vmem_to_hbm [thread:$0]  %s752_s27, 128, %s1670_s7, [#allocation6]   ;;  %vm718_vm5 = vcmp.eq.s32.totalorder %v359_v21, 0  ;;  %vm719_vm6 = vcmp.eq.s32.totalorder %v1515_v22, 0  ;;  %vm731_vm7 = vcmp.eq.s32.totalorder %v1515_v22, 1 }
 0x1c4   :  { %vm720_vm8 = vmand %vm718_vm5, %vm719_vm6  ;;  %s1183_s18 = smov [#allocation16]  }
 0x1c5   :  { %vm732_vm9 = vmand %vm718_vm5, %vm731_vm7  ;;  %s783_s1 = sshll.u32 %s1183_s18, 4  ;;  %s784_s1 = int_to_ptr.vmem [resolvable:$true] %s783_s1 }
 0x1c6   :  { %s1136_s14 = scalar_lea.vmem %s784_s1, 128  ;;  %p1141_p1 = scmp.lt.s32.totalorder %s784_s1, %s784_s1 }
 0x1c7   :  { %p1137_p0 = scmp.ne.s32.totalorder %s784_s1, %s1136_s14  ;;  %p1142_p2 = scmp.lt.s32.totalorder %s1136_s14, %s1136_s14 }
 0x1c9   :  { %p1143_p3 = por %p1142_p2, %p1141_p1 }
 0x1cb   :  { %p1144_p4 = pnand %p1143_p3, %p1137_p0 }
 0x216   :  { %v728_v29 = vpop.permute.xlu0 %727 }
 0x217   :  { %v730_v59 = vsel %vm720_vm8, %v728_v29, 0.0  ;;  %v740_v17 = vpop.permute.xlu1 %739 }
 0x218   :  { %v742_v43 = vsel %vm732_vm9, %v740_v17, 0.0 }
 0x219   :  { %v743_v63 = vadd.f32 %v742_v43, %v730_v59 }
 0x21b   :  { %744 = vst [vmem:[#allocation16] sm:$0xff] %v743_v63 }
 0x21c   :  { %1147 = shalt.err (!%p1144_p4)
}
 0x21d   :  { %s1148_s20 = scalar_lea.hbm %s1673_s10, 128 }
 0x21e   :  { %p1149_p5 = scmp.ne.s32.totalorder %s1673_s10, %s1148_s20  ;;  %p1152_p6 = scmp.lt.u32.totalorder %s1148_s20, %s1673_s10 }
 0x220   :  { %p1154_p7 = pnand %p1152_p6, %p1149_p5 }
 0x222   :  { %1157 = shalt.err (!%p1154_p7)
}
 0x223   :  { %786 = dma.vmem_to_hbm [thread:$0]  %s784_s1, 128, %s1673_s10, [#allocation17]  }
 0x224   :  { %1164 = dma.done.wait [#allocation6], 128  }
 0x225   :  { %1165 = vsyncadd [#allocation6], 4294967168 }
 0x226   :  { %1166 = dma.done.wait [#allocation14], 2064  }
 0x227   :  { %1167 = vsyncadd [#allocation14], 4294965232 }
 0x228   :  { %1168 = dma.done.wait [#allocation17], 128  }
 0x229   :  { %1169 = vsyncadd [#allocation17], 4294967168 }
 0x22a   :  { %799 = vsyncpa [#allocation5], 1 }
 0x22b   :  { %800 = vsyncpa [#allocation8], 1 }
 0x22c   :  { %801 = vsyncpa [#allocation11], 1 }
 0x22d   :  { %802 = vsyncpa [#allocation6], 1 }
 0x22e   :  { %803 = vsyncpa [#allocation14], 1 }
 0x22f   :  { %804 = vsyncpa [#allocation17], 1 }

</bundles_post_ra>
